<compile_context>
chip_gen: v6e
topology: v6e:2x2x1
jax: 0.10.0
libtpu: 0.0.40
codegen_flags: <defaults>
</compile_context>

<pallas_src>
import jax
import jax.numpy as jnp
from jax.experimental import pallas as pl
from jax.experimental.pallas import tpu as pltpu


_F_IN = 160           # 2*2*dim_blocks_out + dim_blocks_out, dim_blocks_out = 32
_H1 = 32              # hidden_layer_sizes_output[0]
_H2 = 16              # hidden_layer_sizes_output[1]
_FUSED_H1 = 2 * _H1   # 64 : both heads, layer 1
_FUSED_H2 = 2 * _H2   # 32 : both heads, layer 2 (block diagonal)
_FUSED_OUT = 2        # (output, u)

_MiB = 1024 * 1024


def _softplus(x):
    # Matches torch.nn.Softplus(beta=1, threshold=20):
    # softplus(x) = log1p(exp(x)), linear passthrough for x > 20.
    return jnp.where(x > 20.0, x, jnp.log1p(jnp.exp(jnp.minimum(x, 20.0))))


def _megnet_fused_kernel(x_ref, w1_ref, b1_ref, w2_ref, b2_ref, w3_ref, b3_ref,
                         out_ref):
    # vec arrives over DMA as f32; the cast to the matmul dtype happens here on
    # the VPU (free, hidden under the input DMA).  No-op when w1 is f32.
    x = x_ref[...].astype(w1_ref.dtype)

    # Layer 1: (TB,160) @ (160,64) on the MXU, f32 accumulation.
    h = jnp.dot(x, w1_ref[...], preferred_element_type=jnp.float32) + b1_ref[...]
    h = _softplus(h)
    # Layer 2: (TB,64) @ (64,32) block-diagonal (heads don't mix).
    h = jnp.dot(h, w2_ref[...], preferred_element_type=jnp.float32) + b2_ref[...]
    h = _softplus(h)
    # Layer 3: (TB,32) @ (32,2): column 0 = output head, column 1 = u head.
    y = jnp.dot(h, w3_ref[...], preferred_element_type=jnp.float32) + b3_ref[...]
    out_ref[...] = y.astype(out_ref.dtype)


def pack_fused_params(params, *, matmul_dtype=jnp.bfloat16):
    """Packs the two per-head MLPs into one block-diagonal fused MLP."""
    w1 = jnp.concatenate([params["w1o"], params["w1u"]], axis=1)        # (160, 64)
    b1 = jnp.concatenate([params["b1o"], params["b1u"]], axis=1)        # (1, 64)
    z2 = jnp.zeros((_H1, _H2), jnp.float32)
    w2 = jnp.block([[params["w2o"], z2], [z2, params["w2u"]]])          # (64, 32)
    b2 = jnp.concatenate([params["b2o"], params["b2u"]], axis=1)        # (1, 32)
    z3 = jnp.zeros((_H2, 1), jnp.float32)
    w3 = jnp.block([[params["w3o"], z3], [z3, params["w3u"]]])          # (32, 2)
    b3 = jnp.concatenate([params["b3o"], params["b3u"]], axis=1)        # (1, 2)
    return dict(
        # w1 dtype sets the layer-1 matmul dtype; the kernel casts vec to match.
        w1=w1.astype(matmul_dtype),
        b1=b1, w2=w2, b2=b2, w3=w3, b3=b3,
    )


def _vmem_budget_bytes():
    """~48 MiB on v7x (64 MiB physical VMEM), ~96 MiB on v5e/v6e (128 MiB)."""
    try:
        cap = int(getattr(pltpu.get_tpu_info(), "vmem_capacity_bytes"))
    except Exception:
        cap = 64 * _MiB   # conservative fallback (v7x-sized)
    return max(32 * _MiB, min(96 * _MiB, (cap * 3) // 4))


def _choose_tb(batch, tile_b):
    """Batch rows per grid step (sublane extent of every block)."""
    if batch < 1024 and batch <= tile_b:
        return batch                     # single full-extent block (always legal)
    # Keep >=2 grid steps (v7x megacore sharding of the "parallel" axis) and
    # 128-row alignment for clean (8,128) tiling; Pallas masks the partial
    # trailing block.
    tb = min(tile_b, -(-batch // 2))
    return max(128, (tb // 128) * 128)


def megnet_regression_forward(vec, params, *, tile_b=None,
                              matmul_dtype=jnp.bfloat16,
                              vmem_limit_bytes=None):
    """Fused two-head MLP forward.

    Args:
      vec: (B, 160) float32 feature vectors (streamed to the kernel as f32).
      params: per-head params as produced by init_params (weights (in,out),
              biases (1,out)).
      tile_b: batch rows per grid step; None = auto (8192, or 16384 when the
              VMEM budget allows, i.e. v5e/v6e).
      matmul_dtype: dtype of the layer-1 matmul operands (vec cast in-kernel).
                    Use jnp.float32 for bit-faithful torch numerics.
      vmem_limit_bytes: scoped-VMEM limit; None = ~75% of detected VMEM.

    Returns:
      (output, u): each of shape (B,) — matching torch.squeeze of (B, 1).
    """
    B, F = vec.shape
    assert F == _F_IN, f"expected feature dim {_F_IN}, got {F}"
    fused = pack_fused_params(params, matmul_dtype=matmul_dtype)

    if vmem_limit_bytes is None:
        vmem_limit_bytes = _vmem_budget_bytes()
    if tile_b is None:
        # 8192-row f32 tile = ~8 MiB/buffer (fits v7x's 48 MiB budget once
        # double-buffered with intermediates); 16384 on 128 MiB-VMEM chips.
        tile_b = 16384 if vmem_limit_bytes >= 80 * _MiB else 8192

    tb = _choose_tb(B, tile_b)
    grid = (pl.cdiv(B, tb),)

    weight_bytes = sum(int(v.size) * v.dtype.itemsize for v in fused.values())
    cost = pl.CostEstimate(
        flops=2 * B * (_F_IN * _FUSED_H1 + _FUSED_H1 * _FUSED_H2
                       + _FUSED_H2 * _FUSED_OUT),
        transcendentals=2 * B * (_FUSED_H1 + _FUSED_H2),    # exp + log1p / unit
        # f32 vec read + f32 (B,2) write + resident weights; no extra cast pass.
        bytes_accessed=B * _F_IN * 4 + B * _FUSED_OUT * 4 + weight_bytes,
    )

    out = pl.pallas_call(
        _megnet_fused_kernel,
        out_shape=jax.ShapeDtypeStruct((B, _FUSED_OUT), jnp.float32),
        grid=grid,
        in_specs=[
            pl.BlockSpec((tb, _F_IN), lambda i: (i, 0)),             # vec tile (pipelined, f32)
            pl.BlockSpec((_F_IN, _FUSED_H1), lambda i: (0, 0)),      # w1 (VMEM-resident)
            pl.BlockSpec((1, _FUSED_H1), lambda i: (0, 0)),          # b1
            pl.BlockSpec((_FUSED_H1, _FUSED_H2), lambda i: (0, 0)),  # w2
            pl.BlockSpec((1, _FUSED_H2), lambda i: (0, 0)),          # b2
            pl.BlockSpec((_FUSED_H2, _FUSED_OUT), lambda i: (0, 0)), # w3
            pl.BlockSpec((1, _FUSED_OUT), lambda i: (0, 0)),         # b3
        ],
        out_specs=pl.BlockSpec((tb, _FUSED_OUT), lambda i: (i, 0)),
        compiler_params=pltpu.CompilerParams(
            dimension_semantics=("parallel",),
            vmem_limit_bytes=int(vmem_limit_bytes),
        ),
        cost_estimate=cost,
    )(vec.astype(jnp.float32), fused["w1"], fused["b1"], fused["w2"],
      fused["b2"], fused["w3"], fused["b3"])

    # torch.squeeze of the per-head (B, 1) outputs -> (B,)
    return out[:, 0], out[:, 1]


def init_params(key, dim_in=_F_IN, hidden=(_H1, _H2)):
    """Deterministic synthetic parameters matching the module's MLP shapes."""
    dims = [dim_in, *hidden, 1]
    keys = jax.random.split(key, 2 * (len(dims) - 1) * 2)
    params = {}
    ki = 0
    for head in ("o", "u"):
        for li in range(len(dims) - 1):
            fan_in, fan_out = dims[li], dims[li + 1]
            scale = 1.0 / jnp.sqrt(jnp.float32(fan_in))
            w = jax.random.uniform(
                keys[ki], (fan_in, fan_out), jnp.float32, -scale, scale)
            ki += 1
            b = jax.random.uniform(
                keys[ki], (1, fan_out), jnp.float32, -scale, scale)
            ki += 1
            params[f"w{li + 1}{head}"] = w
            params[f"b{li + 1}{head}"] = b
    return params


def _reference_forward_f32(vec, params):
    """Pure-JAX f32 per-head reference (torch semantics)."""
    def mlp(x, head):
        h = _softplus(x @ params[f"w1{head}"] + params[f"b1{head}"])
        h = _softplus(h @ params[f"w2{head}"] + params[f"b2{head}"])
        return h @ params[f"w3{head}"] + params[f"b3{head}"]
    return jnp.squeeze(mlp(vec, "o"), -1), jnp.squeeze(mlp(vec, "u"), -1)


def _reference_forward_fused(vec, params, matmul_dtype=jnp.bfloat16):
    """Pure-JAX reference using the exact fused / cast numerics of the kernel."""
    fused = pack_fused_params(params, matmul_dtype=matmul_dtype)
    x = vec.astype(jnp.float32).astype(fused["w1"].dtype)
    h = _softplus(jnp.dot(x, fused["w1"],
                          preferred_element_type=jnp.float32) + fused["b1"])
    h = _softplus(jnp.dot(h, fused["w2"],
                          preferred_element_type=jnp.float32) + fused["b2"])
    y = jnp.dot(h, fused["w3"], preferred_element_type=jnp.float32) + fused["b3"]
    return y[:, 0], y[:, 1]


if __name__ == "__main__":
    key = jax.random.PRNGKey(0)
    k_vec, k_params = jax.random.split(key)

    # Small shapes consistent with the module: F = 2*2*32 + 32 = 160.
    B = 8
    vec = jax.random.normal(k_vec, (B, _F_IN), jnp.float32)
    params = init_params(k_params)

    out, u = megnet_regression_forward(vec, params)
    out, u = jax.block_until_ready((out, u))
    assert out.shape == (B,) and u.shape == (B,)

    # Tight check vs a pure-JAX version with identical (fused, bf16-layer-1) numerics.
    ref_o, ref_u = _reference_forward_fused(vec, params)
    assert jnp.allclose(out, ref_o, atol=1e-5, rtol=1e-5)
    assert jnp.allclose(u, ref_u, atol=1e-5, rtol=1e-5)

    # Loose check vs the full-f32 per-head (torch-style) reference.
    f32_o, f32_u = _reference_forward_f32(vec, params)
    assert jnp.allclose(out, f32_o, atol=3e-2, rtol=3e-2)
    assert jnp.allclose(u, f32_u, atol=3e-2, rtol=3e-2)

    # Full-f32 kernel path matches the torch-style reference tightly.
    out32, u32 = megnet_regression_forward(vec, params, matmul_dtype=jnp.float32)
    out32, u32 = jax.block_until_ready((out32, u32))
    assert jnp.allclose(out32, f32_o, atol=1e-5, rtol=1e-5)
    assert jnp.allclose(u32, f32_u, atol=1e-5, rtol=1e-5)

    # Exercise the batch grid: 2 steps + masked partial trailing tile.
    B2 = 200
    vec2 = jax.random.normal(jax.random.PRNGKey(1), (B2, _F_IN), jnp.float32)
    out2, u2 = megnet_regression_forward(vec2, params, tile_b=128)
    out2, u2 = jax.block_until_ready((out2, u2))
    assert out2.shape == (B2,) and u2.shape == (B2,)
    ref2_o, ref2_u = _reference_forward_fused(vec2, params)
    assert jnp.allclose(out2, ref2_o, atol=1e-5, rtol=1e-5)
    assert jnp.allclose(u2, ref2_u, atol=1e-5, rtol=1e-5)

    print("KERNEL_OK")
</pallas_src>

<mosaic_0001>
module attributes {stable_mosaic.version = 11 : i64} {
  func.func @_megnet_fused_kernel(%arg0: i32, %arg1: memref<8x160xf32, #tpu.memory_space<vmem>>, %arg2: memref<160x64xbf16, #tpu.memory_space<vmem>>, %arg3: memref<1x64xf32, #tpu.memory_space<vmem>>, %arg4: memref<64x32xf32, #tpu.memory_space<vmem>>, %arg5: memref<1x32xf32, #tpu.memory_space<vmem>>, %arg6: memref<32x2xf32, #tpu.memory_space<vmem>>, %arg7: memref<1x2xf32, #tpu.memory_space<vmem>>, %arg8: memref<8x2xf32, #tpu.memory_space<vmem>>) attributes {dimension_semantics = [#tpu.dimension_semantics<parallel>], iteration_bounds = array<i64: 1>, scalar_prefetch = 0 : i64, scratch_operands = 0 : i64, tpu.core_type = #tpu.core_type<tc>, window_params = [{transform_indices = @transform_0, window_bounds = array<i64: 8, 160>}, {pipeline_mode = #tpu.pipeline_mode<synchronous>, transform_indices = @transform_1, window_bounds = array<i64: 160, 64>}, {pipeline_mode = #tpu.pipeline_mode<synchronous>, transform_indices = @transform_2, window_bounds = array<i64: 1, 64>}, {pipeline_mode = #tpu.pipeline_mode<synchronous>, transform_indices = @transform_3, window_bounds = array<i64: 64, 32>}, {pipeline_mode = #tpu.pipeline_mode<synchronous>, transform_indices = @transform_4, window_bounds = array<i64: 1, 32>}, {pipeline_mode = #tpu.pipeline_mode<synchronous>, transform_indices = @transform_5, window_bounds = array<i64: 32, 2>}, {pipeline_mode = #tpu.pipeline_mode<synchronous>, transform_indices = @transform_6, window_bounds = array<i64: 1, 2>}, {transform_indices = @transform_7, window_bounds = array<i64: 8, 2>}]} {
    %c0 = arith.constant 0 : index
    %c0_0 = arith.constant 0 : index
    %0 = vector.load %arg1[%c0, %c0_0] : memref<8x160xf32, #tpu.memory_space<vmem>>, vector<8x160xf32>
    %1 = arith.truncf %0 : vector<8x160xf32> to vector<8x160xbf16>
    %c0_1 = arith.constant 0 : index
    %c0_2 = arith.constant 0 : index
    %2 = vector.load %arg2[%c0_1, %c0_2] : memref<160x64xbf16, #tpu.memory_space<vmem>>, vector<160x64xbf16>
    %cst = arith.constant dense<0.000000e+00> : vector<8x64xf32>
    %3 = tpu.matmul %1, %2, %cst {dimension_numbers = #tpu.dot_dimension_numbers<[1], [0], [0], [1], [0, 0, 1, 1], [], []>} : vector<8x160xbf16>, vector<160x64xbf16>, vector<8x64xf32> -> vector<8x64xf32>
    %c0_3 = arith.constant 0 : index
    %c0_4 = arith.constant 0 : index
    %4 = vector.load %arg3[%c0_3, %c0_4] : memref<1x64xf32, #tpu.memory_space<vmem>>, vector<1x64xf32>
    %5 = vector.broadcast %4 : vector<1x64xf32> to vector<8x64xf32>
    %6 = arith.addf %3, %5 : vector<8x64xf32>
    %cst_5 = arith.constant 2.000000e+01 : f32
    %7 = vector.broadcast %cst_5 : f32 to vector<8x64xf32>
    %8 = arith.cmpf ogt, %6, %7 : vector<8x64xf32>
    %cst_6 = arith.constant 2.000000e+01 : f32
    %9 = vector.broadcast %cst_6 : f32 to vector<8x64xf32>
    %10 = arith.minimumf %6, %9 : vector<8x64xf32>
    %11 = math.exp %10 : vector<8x64xf32>
    %12 = math.log1p %11 : vector<8x64xf32>
    %13 = arith.select %8, %6, %12 : vector<8x64xi1>, vector<8x64xf32>
    %c0_7 = arith.constant 0 : index
    %c0_8 = arith.constant 0 : index
    %14 = vector.load %arg4[%c0_7, %c0_8] : memref<64x32xf32, #tpu.memory_space<vmem>>, vector<64x32xf32>
    %cst_9 = arith.constant dense<0.000000e+00> : vector<8x32xf32>
    %15 = tpu.matmul %13, %14, %cst_9 {dimension_numbers = #tpu.dot_dimension_numbers<[1], [0], [0], [1], [0, 0, 1, 1], [], []>} : vector<8x64xf32>, vector<64x32xf32>, vector<8x32xf32> -> vector<8x32xf32>
    %c0_10 = arith.constant 0 : index
    %c0_11 = arith.constant 0 : index
    %16 = vector.load %arg5[%c0_10, %c0_11] : memref<1x32xf32, #tpu.memory_space<vmem>>, vector<1x32xf32>
    %17 = vector.broadcast %16 : vector<1x32xf32> to vector<8x32xf32>
    %18 = arith.addf %15, %17 : vector<8x32xf32>
    %cst_12 = arith.constant 2.000000e+01 : f32
    %19 = vector.broadcast %cst_12 : f32 to vector<8x32xf32>
    %20 = arith.cmpf ogt, %18, %19 : vector<8x32xf32>
    %cst_13 = arith.constant 2.000000e+01 : f32
    %21 = vector.broadcast %cst_13 : f32 to vector<8x32xf32>
    %22 = arith.minimumf %18, %21 : vector<8x32xf32>
    %23 = math.exp %22 : vector<8x32xf32>
    %24 = math.log1p %23 : vector<8x32xf32>
    %25 = arith.select %20, %18, %24 : vector<8x32xi1>, vector<8x32xf32>
    %c0_14 = arith.constant 0 : index
    %c0_15 = arith.constant 0 : index
    %26 = vector.load %arg6[%c0_14, %c0_15] : memref<32x2xf32, #tpu.memory_space<vmem>>, vector<32x2xf32>
    %cst_16 = arith.constant dense<0.000000e+00> : vector<8x2xf32>
    %27 = tpu.matmul %25, %26, %cst_16 {dimension_numbers = #tpu.dot_dimension_numbers<[1], [0], [0], [1], [0, 0, 1, 1], [], []>} : vector<8x32xf32>, vector<32x2xf32>, vector<8x2xf32> -> vector<8x2xf32>
    %c0_17 = arith.constant 0 : index
    %c0_18 = arith.constant 0 : index
    %28 = vector.load %arg7[%c0_17, %c0_18] : memref<1x2xf32, #tpu.memory_space<vmem>>, vector<1x2xf32>
    %29 = vector.broadcast %28 : vector<1x2xf32> to vector<8x2xf32>
    %30 = arith.addf %27, %29 : vector<8x2xf32>
    %c0_19 = arith.constant 0 : index
    %c0_20 = arith.constant 0 : index
    %31 = vector.load %arg8[%c0_19, %c0_20] : memref<8x2xf32, #tpu.memory_space<vmem>>, vector<8x2xf32>
    tpu.vector_store %arg8[%c0_19, %c0_20], %30 {strides = array<i32>} : memref<8x2xf32, #tpu.memory_space<vmem>>, vector<8x2xf32>,
    return
  }
  func.func @transform_0(%arg0: i32) -> (i32, i32) {
    %c0_i32 = arith.constant 0 : i32
    %c0_i32_0 = arith.constant 0 : i32
    return %arg0, %c0_i32 : i32, i32
  }
  func.func @transform_1(%arg0: i32) -> (i32, i32) {
    %c0_i32 = arith.constant 0 : i32
    %c0_i32_0 = arith.constant 0 : i32
    %c0_i32_1 = arith.constant 0 : i32
    return %c0_i32, %c0_i32_0 : i32, i32
  }
  func.func @transform_2(%arg0: i32) -> (i32, i32) {
    %c0_i32 = arith.constant 0 : i32
    %c0_i32_0 = arith.constant 0 : i32
    %c0_i32_1 = arith.constant 0 : i32
    return %c0_i32, %c0_i32_0 : i32, i32
  }
  func.func @transform_3(%arg0: i32) -> (i32, i32) {
    %c0_i32 = arith.constant 0 : i32
    %c0_i32_0 = arith.constant 0 : i32
    %c0_i32_1 = arith.constant 0 : i32
    return %c0_i32, %c0_i32_0 : i32, i32
  }
  func.func @transform_4(%arg0: i32) -> (i32, i32) {
    %c0_i32 = arith.constant 0 : i32
    %c0_i32_0 = arith.constant 0 : i32
    %c0_i32_1 = arith.constant 0 : i32
    return %c0_i32, %c0_i32_0 : i32, i32
  }
  func.func @transform_5(%arg0: i32) -> (i32, i32) {
    %c0_i32 = arith.constant 0 : i32
    %c0_i32_0 = arith.constant 0 : i32
    %c0_i32_1 = arith.constant 0 : i32
    return %c0_i32, %c0_i32_0 : i32, i32
  }
  func.func @transform_6(%arg0: i32) -> (i32, i32) {
    %c0_i32 = arith.constant 0 : i32
    %c0_i32_0 = arith.constant 0 : i32
    %c0_i32_1 = arith.constant 0 : i32
    return %c0_i32, %c0_i32_0 : i32, i32
  }
  func.func @transform_7(%arg0: i32) -> (i32, i32) {
    %c0_i32 = arith.constant 0 : i32
    %c0_i32_0 = arith.constant 0 : i32
    return %arg0, %c0_i32 : i32, i32
  }
}

</mosaic_0001>

<bundles_post_ra>
// kernel: tpu_custom_call.1
= control target key start
LH: loop header
LB: loop body
LE: loop exit
PB: predicated region body
PF: predicated region fallthrough
CT: control target
= control target key end

     0   :  { %v450_v0 = vmov 0   ;;  %vm118_vm0 = vcmask 261120   ;;  %v451_v15 = vmov 0.0   ;;  %vm452_vm1 = vmmov 0   ;;  %s581_s1 = inlined_call_operand.vmem [shape: bf16[160,64], index: 1, kind: input, shape index: {}]   ;;  %s582_s0 = inlined_call_operand.vmem [shape: f32[8,160], index: 0, kind: input, shape index: {}]   ;;  %s583_s3 = inlined_call_operand.vmem [shape: f32[64,32], index: 3, kind: input, shape index: {}]   ;;  %s584_s2 = inlined_call_operand.vmem [shape: f32[1,64], index: 2, kind: input, shape index: {}]   ;;  %s585_s5 = inlined_call_operand.vmem [shape: f32[32,2], index: 5, kind: input, shape index: {}]   ;;  %s586_s4 = inlined_call_operand.vmem [shape: f32[1,32], index: 4, kind: input, shape index: {}]   ;;  %s587_s6 = inlined_call_operand.vmem [shape: f32[1,2], index: 6, kind: input, shape index: {}]   ;;  %s588_s7 = inlined_call_operand.vmem [shape: f32[8,2], index: 7, kind: output, shape index: {}]  }
   0x1   :  { %122 = vmatprep.subr.bf16.mxu0 %v450_v0  ;;  %v432_v1 = vld [vmem:[%s581_s1 + $0x38] sm:$0xff]   ;;  %v433_v2 = vld [vmem:[%s581_s1 + $0x30] sm:$0xff]   ;;  %v434_v3 = vld [vmem:[%s581_s1 + $0x28] sm:$0xff]   ;;  %399 = vmatprep.subr.mxu1 %v451_v15  ;;  %vm191_vm3 = vcmask 523264   ;;  %vm363_vm7 = vcmask 15360  }
   0x2   :  { %123 = vmatpush1.bf16.msra.mxu0 %v432_v1  ;;  %v435_v4 = vld [vmem:[%s581_s1 + $0x20] sm:$0xff]   ;;  %v28_v5 = vld [vmem:[%s582_s0 + $0x8] sm:$0xff]  ;;  %v436_v7 = vld [vmem:[%s581_s1 + $0x18] sm:$0xff]   ;;  %415 = vmatprep.mubr.msk.f32.mxu1 %vm452_vm1, %v451_v15 }
   0x3   :  { %124 = vmatprep.subr.bf16.mxu0 %v450_v0  ;;  %v30_v6 = vpack.c.bf16 %v28_v5, %v28_v5  ;;  %v437_v8 = vld [vmem:[%s581_s1 + $0x10] sm:$0xff]   ;;  %v438_v9 = vld [vmem:[%s581_s1 + $0x8] sm:$0xff]   ;;  %v439_v10 = vld [vmem:[%s581_s1] sm:$0xff]  }
   0x4   :  { %v440_v11 = vld [vmem:[%s581_s1 + $0x48] sm:$0xff]   ;;  %v441_v12 = vld [vmem:[%s581_s1 + $0x40] sm:$0xff]   ;;  %v183_v16 = vld [vmem:[%s583_s3 + $0x38] sm:$0xff] }
   0x5   :  { %380 = vmatprep.mubr.msk.bf16.mxu0 %vm118_vm0, %v30_v6  ;;  %v27_v13 = vld [vmem:[%s582_s0] sm:$0xff]  ;;  %v182_v17 = vld [vmem:[%s583_s3 + $0x30] sm:$0xff]  ;;  %400 = vmatpush3.msra.mxu1 %v183_v16  ;;  %v181_v18 = vld [vmem:[%s583_s3 + $0x28] sm:$0xff] }
   0x6   :  { %125 = vmatpush1.bf16.msra.mxu0 %v433_v2  ;;  %v29_v14 = vpack.c.bf16 %v27_v13, %v27_v13  ;;  %401 = vmatprep.subr.mxu1 %v451_v15  ;;  %v180_v19 = vld [vmem:[%s583_s3 + $0x20] sm:$0xff]  ;;  %v179_v20 = vld [vmem:[%s583_s3 + $0x18] sm:$0xff]  ;;  %v178_v21 = vld [vmem:[%s583_s3 + $0x10] sm:$0xff] }
   0x7   :  { %126 = vmatprep.subr.bf16.mxu0 %v450_v0  ;;  %402 = vmatpush3.msra.mxu1 %v182_v17  ;;  %v177_v22 = vld [vmem:[%s583_s3 + $0x8] sm:$0xff]  ;;  %v176_v23 = vld [vmem:[%s583_s3] sm:$0xff]  ;;  %v282_v42 = vld [vmem:[%s585_s5 + $0x18] sm:$0xff] }
   0x8   :  { %403 = vmatprep.subr.mxu1 %v451_v15  ;;  %v369_v24 = vld [vmem:[%s584_s2] ss:$0 sm:$0xff]  ;;  %v281_v43 = vld [vmem:[%s585_s5 + $0x10] sm:$0xff]  ;;  %v280_v44 = vld [vmem:[%s585_s5 + $0x8] sm:$0xff] }
   0x9   :  { %404 = vmatpush3.msra.mxu1 %v181_v18  ;;  %v279_v45 = vld [vmem:[%s585_s5] sm:$0xff] }
   0xa   :  { %127 = vmatpush1.bf16.msra.mxu0 %v434_v3  ;;  %405 = vmatprep.subr.mxu1 %v451_v15  ;;  %v381_v46 = vld [vmem:[%s586_s4] ss:$0 sm:$0xff] }
   0xb   :  { %128 = vmatprep.subr.bf16.mxu0 %v450_v0  ;;  %406 = vmatpush3.msra.mxu1 %v180_v19  ;;  %v383_v62 = vld [vmem:[%s587_s6] ss:$0 sm:$0xff] }
   0xc   :  { %407 = vmatprep.subr.mxu1 %v451_v15 }
   0xd   :  { %408 = vmatpush3.msra.mxu1 %v179_v20 }
   0xe   :  { %129 = vmatpush1.bf16.msra.mxu0 %v435_v4  ;;  %409 = vmatprep.subr.mxu1 %v451_v15 }
   0xf   :  { %130 = vmatprep.subr.bf16.mxu0 %v450_v0  ;;  %410 = vmatpush3.msra.mxu1 %v178_v21 }
  0x10   :  { %411 = vmatprep.subr.mxu1 %v451_v15 }
  0x11   :  { %412 = vmatpush3.msra.mxu1 %v177_v22 }
  0x12   :  { %131 = vmatpush1.bf16.msra.mxu0 %v436_v7  ;;  %413 = vmatprep.subr.mxu1 %v451_v15 }
  0x13   :  { %132 = vmatprep.subr.bf16.mxu0 %v450_v0  ;;  %414 = vmatpush3.msra.mxu1 %v176_v23 }
  0x14   :  { %418 = vmatprep.subr.mxu1 %v451_v15 }
  0x16   :  { %133 = vmatpush1.bf16.msra.mxu0 %v437_v8 }
  0x17   :  { %134 = vmatprep.subr.bf16.mxu0 %v450_v0 }
  0x1a   :  { %135 = vmatpush1.bf16.msra.mxu0 %v438_v9 }
  0x1b   :  { %136 = vmatprep.subr.bf16.mxu0 %v450_v0 }
  0x1e   :  { %137 = vmatpush1.bf16.msra.mxu0 %v439_v10 }
  0x1f   :  { %150 = vmatprep.subr.bf16.mxu0 %v450_v0 }
  0x22   :  { %151 = vmatpush2.bf16.msra.mxu0 %v440_v11 }
  0x23   :  { %152 = vmatprep.subr.bf16.mxu0 %v450_v0 }
  0x26   :  { %153 = vmatpush2.bf16.msra.mxu0 %v441_v12 }
  0x29   :  { %155 = vmatmul.mubr.bf16.vlgmr.msra.gmra.mxu0 %v29_v14 }
  0xe9   :  { %v156_v25 = vpop.f32.mrf.mxu0 }
  0xea   :  { %v157_v26 = vadd.f32 %v369_v24, %v156_v25 }
  0xeb   :  { %v158_v27 = vpop.f32.mrf.mxu0 }
  0xec   :  { %v163_v28 = vmin.f32 %v157_v26, 20.0  ;;  %vm162_vm4 = vcmp.gt.f32.partialorder %v157_v26, 20.0 }
  0xed   :  { %v159_v29 = vpop.f32.mrf.mxu0 }
  0xee   :  { %v164_v30 = vmul.f32 1.442695, %v163_v28 }
  0xef   :  { %v160_v31 = vpop.f32.mrf.mxu0 }
  0xf0   :  { %442 = vpow2.f32 %v164_v30 }
  0xfd   :  { %v443_v32 = vpop.eup %442 }
  0xfe   :  { %v166_v33 = vadd.f32 1.0, %v443_v32  ;;  %v169_v34 = vmul.f32 -0.5, %v443_v32  ;;  %v172_v36 = vand.u32 2147483647, %v443_v32 }
 0x100   :  { %444 = vlog2.f32 %v166_v33  ;;  %v170_v35 = vadd.f32 1.0, %v169_v34  ;;  %vm173_vm2 = vcmp.lt.f32.partialorder %v172_v36, 0.0004427343 }
 0x102   :  { %v171_v39 = vmul.f32 %v443_v32, %v170_v35 }
 0x10d   :  { %v445_v37 = vpop.eup %444 }
 0x10e   :  { %v168_v38 = vmul.f32 0.6931472, %v445_v37 }
 0x110   :  { %v174_v40 = vsel %vm173_vm2, %v171_v39, %v168_v38 }
 0x111   :  { %v175_v41 = vsel %vm162_vm4, %v157_v26, %v174_v40 }
 0x112   :  { %416 = vmatmul.mubr.msk.f32.vlgmr.msra.gmra.mxu1 %vm191_vm3, %v175_v41 }
 0x113   :  { %426 = vmatprep.mubr.msk.f32.mxu1 %vm452_vm1, %v451_v15  ;;  %419 = vmatpush3.msra.mxu1 %v282_v42 }
 0x114   :  { %420 = vmatprep.subr.mxu1 %v451_v15 }
 0x115   :  { %421 = vmatpush3.msra.mxu1 %v281_v43 }
 0x116   :  { %422 = vmatprep.subr.mxu1 %v451_v15 }
 0x117   :  { %423 = vmatpush3.msra.mxu1 %v280_v44 }
 0x118   :  { %424 = vmatprep.subr.mxu1 %v451_v15 }
 0x119   :  { %425 = vmatpush3.msra.mxu1 %v279_v45 }
 0x1d2   :  { %v261_v47 = vpop.f32.mrf.mxu1 }
 0x1d3   :  { %v262_v48 = vadd.f32 %v381_v46, %v261_v47 }
 0x1d4   :  { %v417_v49 = vpop.f32.mrf.mxu1 }
 0x1d5   :  { %v266_v50 = vmin.f32 %v262_v48, 20.0  ;;  %vm265_vm6 = vcmp.gt.f32.partialorder %v262_v48, 20.0 }
 0x1d7   :  { %v267_v51 = vmul.f32 1.442695, %v266_v50 }
 0x1d9   :  { %446 = vpow2.f32 %v267_v51 }
 0x1e6   :  { %v447_v52 = vpop.eup %446 }
 0x1e7   :  { %v269_v53 = vadd.f32 1.0, %v447_v52  ;;  %v272_v54 = vmul.f32 -0.5, %v447_v52  ;;  %v275_v56 = vand.u32 2147483647, %v447_v52 }
 0x1e9   :  { %448 = vlog2.f32 %v269_v53  ;;  %v273_v55 = vadd.f32 1.0, %v272_v54  ;;  %vm276_vm5 = vcmp.lt.f32.partialorder %v275_v56, 0.0004427343 }
 0x1eb   :  { %v274_v59 = vmul.f32 %v447_v52, %v273_v55 }
 0x1f6   :  { %v449_v57 = vpop.eup %448 }
 0x1f7   :  { %v271_v58 = vmul.f32 0.6931472, %v449_v57 }
 0x1f9   :  { %v277_v60 = vsel %vm276_vm5, %v274_v59, %v271_v58 }
 0x1fa   :  { %v278_v61 = vsel %vm265_vm6, %v262_v48, %v277_v60 }
 0x1fb   :  { %427 = vmatmul.mubr.msk.f32.vlgmr.msra.gmra.mxu1 %vm118_vm0, %v278_v61 }
 0x2bb   :  { %v359_v63 = vpop.f32.mrf.mxu1 }
 0x2bc   :  { %v360_v0 = vadd.f32 %v383_v62, %v359_v63 }
 0x2bd   :  { %v428_v1 = vpop.f32.mrf.mxu1 }
 0x2be   :  { %364 = vst.msk [vmem:[%s588_s7] sm:$0xff] %vm363_vm7, %v360_v0 }

</bundles_post_ra>
